<compile_context>
chip_gen: v7x
topology: tpu7x:2x2x1
jax: 0.10.0
libtpu: 0.0.40
codegen_flags: <defaults>
</compile_context>

<pallas_src>
import functools

import jax
import jax.numpy as jnp
from jax import lax
from jax.experimental import pallas as pl
from jax.experimental.pallas import tpu as pltpu


def _round_up(x, m):
    return (x + m - 1) // m * m


def _matmul_bias_act_kernel(p_ref, w_ref, b_ref, o_ref, acc_ref, *, apply_relu):
    # p_ref:   [TM, TK]  im2col patch rows (tap-stacked contraction dim)
    # w_ref:   [TK, TN]  BN-scale-folded weights
    # b_ref:   [1, TN]   BN shift (zeros if batchnorm disabled)
    # o_ref:   [TM, TN]  output tile
    # acc_ref: [TM, TN]  f32 accumulator; K is the innermost grid axis (axis 2)
    k = pl.program_id(2)

    @pl.when(k == 0)
    def _():
        acc_ref[...] = jnp.zeros_like(acc_ref)

    acc_ref[...] += jnp.dot(p_ref[...], w_ref[...],
                            preferred_element_type=jnp.float32)

    @pl.when(k == pl.num_programs(2) - 1)
    def _():
        y = acc_ref[...] + b_ref[...]
        if apply_relu:
            y = jnp.maximum(y, 0.0)
        o_ref[...] = y.astype(o_ref.dtype)


def conv2d_module_forward(x_nchw, weight_oihw, *, stride=1,
                          bn_gamma=None, bn_beta=None, bn_mean=None, bn_var=None,
                          bn_eps=1e-5, batchnorm=True, relu=True,
                          compute_dtype=jnp.float32):
    """Matches Conv2dModule.forward: Conv2d(k=stride+2, stride, pad=1, bias=False)
    -> BatchNorm2d (eval) -> ReLU.  x_nchw: [N, Cin, H, W], weight: [Cout, Cin, K, K].

    compute_dtype: dtype of the matmul operands (use jnp.bfloat16 in production
    on v6e/v7x; accumulation and the BN/ReLU tail stay f32)."""
    N, Cin, H, W = x_nchw.shape
    Cout, Cin_w, KH, KW = weight_oihw.shape
    assert Cin_w == Cin and KH == KW == stride + 2
    if batchnorm and any(a is None for a in (bn_gamma, bn_beta, bn_mean, bn_var)):
        raise ValueError("batchnorm=True requires bn_gamma, bn_beta, bn_mean, bn_var")

    pad = 1
    OH = (H + 2 * pad - KH) // stride + 1
    OW = (W + 2 * pad - KW) // stride + 1

    # ---- Wrapper-side im2col / space-to-depth (XLA glue, outside the kernel).
    # Every in-kernel access becomes unit-stride and lane-dense; stride>1 is
    # absorbed here, growing the matmul contraction dim instead of producing
    # strided in-kernel slices.
    x_nhwc = jnp.transpose(x_nchw, (0, 2, 3, 1))
    x_pad = jnp.pad(x_nhwc, ((0, 0), (pad, pad), (pad, pad), (0, 0)))
    taps = []
    for ky in range(KH):
        for kx in range(KW):
            taps.append(x_pad[:, ky:ky + (OH - 1) * stride + 1:stride,
                                 kx:kx + (OW - 1) * stride + 1:stride, :])
    K_raw = KH * KW * Cin
    M = N * OH * OW
    patches = jnp.concatenate(taps, axis=-1).reshape(M, K_raw)

    # ---- Tile sizes (lane-dense, generation-friendly).
    TN = 256 if Cout % 256 == 0 else 128          # 256 feeds v6e/v7x MXU width
    Coutp = _round_up(Cout, TN)                   # padded Cout -> unmasked stores
    if K_raw <= 1024:
        TK = _round_up(K_raw, 128)
        Kp = TK
    else:
        TK = 512
        Kp = _round_up(K_raw, TK)
    TM = 256 if M >= 256 else _round_up(M, 8)
    Mp = _round_up(M, TM)

    patches = jnp.pad(patches.astype(compute_dtype),
                      ((0, Mp - M), (0, Kp - K_raw)))

    # ---- Weights: [Cout, Cin, KH, KW] -> [KH*KW*Cin, Cout], matching the tap
    # order above; fold the eval-mode BN scale into the weights so only the
    # per-channel shift + ReLU remain in the kernel tail.
    w2 = jnp.transpose(weight_oihw, (2, 3, 1, 0)).reshape(K_raw, Cout)
    if batchnorm:
        scale = (bn_gamma.astype(jnp.float32)
                 * lax.rsqrt(bn_var.astype(jnp.float32) + bn_eps))
        bias = bn_beta.astype(jnp.float32) - bn_mean.astype(jnp.float32) * scale
        w2 = w2 * scale[None, :]
    else:
        bias = jnp.zeros((Cout,), jnp.float32)
    w2 = jnp.pad(w2.astype(compute_dtype), ((0, Kp - K_raw), (0, Coutp - Cout)))
    bias = jnp.pad(bias, (0, Coutp - Cout)).reshape(1, Coutp)

    ni, nj, nk = Mp // TM, Coutp // TN, Kp // TK

    # ---- Grid order: keep the operand whose re-streaming would cost the most
    # HBM bytes resident along the inner sweep (only matters when nk == 1;
    # with nk > 1 both operands are re-streamed either way).
    itemsize = jnp.dtype(compute_dtype).itemsize
    patch_bytes = Mp * Kp * itemsize
    weight_bytes = Kp * Coutp * itemsize
    cout_outer = (nj - 1) * patch_bytes <= (ni - 1) * weight_bytes
    if cout_outer:
        grid = (nj, ni, nk)
        lhs_map = lambda j, i, k: (i, k)
        rhs_map = lambda j, i, k: (k, j)
        bias_map = lambda j, i, k: (0, j)
        out_map = lambda j, i, k: (i, j)
    else:
        grid = (ni, nj, nk)
        lhs_map = lambda i, j, k: (i, k)
        rhs_map = lambda i, j, k: (k, j)
        bias_map = lambda i, j, k: (0, j)
        out_map = lambda i, j, k: (i, j)

    # ---- VMEM budget (double-buffered blocks + f32 accumulator), with
    # headroom, clamped to stay safe on v7x's 64 MiB per-TC VMEM.
    block_bytes = (2 * TM * TK * itemsize      # lhs, double-buffered
                   + 2 * TK * TN * itemsize    # rhs, double-buffered
                   + 2 * TN * 4                # bias
                   + 2 * TM * TN * 4           # out f32, double-buffered
                   + TM * TN * 4)              # accumulator scratch
    vmem_limit = int(min(max(4 * block_bytes, 16 << 20), 64 << 20))

    kernel = functools.partial(_matmul_bias_act_kernel, apply_relu=relu)

    out_mat = pl.pallas_call(
        kernel,
        out_shape=jax.ShapeDtypeStruct((Mp, Coutp), jnp.float32),
        grid=grid,
        in_specs=[
            pl.BlockSpec((TM, TK), lhs_map),
            pl.BlockSpec((TK, TN), rhs_map),
            pl.BlockSpec((1, TN), bias_map),
        ],
        out_specs=pl.BlockSpec((TM, TN), out_map),
        scratch_shapes=[pltpu.VMEM((TM, TN), jnp.float32)],
        compiler_params=pltpu.CompilerParams(
            dimension_semantics=("parallel", "parallel", "arbitrary"),
            vmem_limit_bytes=vmem_limit),
    )(patches, w2, bias)

    out = out_mat[:M, :Cout].reshape(N, OH, OW, Cout)
    return jnp.transpose(out, (0, 3, 1, 2))      # back to NCHW


def _reference(x, weight, stride, gamma, beta, mean, var, eps):
    y = lax.conv_general_dilated(
        x, weight, window_strides=(stride, stride),
        padding=((1, 1), (1, 1)),
        dimension_numbers=("NCHW", "OIHW", "NCHW"),
        precision=lax.Precision.HIGHEST)
    inv_std = gamma / jnp.sqrt(var + eps)
    y = (y - mean[None, :, None, None]) * inv_std[None, :, None, None] \
        + beta[None, :, None, None]
    return jnp.maximum(y, 0.0)


if __name__ == "__main__":
    key = jax.random.PRNGKey(0)
    eps = 1e-5

    for (N, Cin, Cout, H, W, stride) in [(2, 4, 32, 16, 16, 1),
                                         (2, 4, 32, 16, 16, 2)]:
        k_x, k_w, k_g, k_b, k_m, k_v, key = jax.random.split(key, 7)
        K = stride + 2

        x = jax.random.normal(k_x, (N, Cin, H, W), dtype=jnp.float32)
        bound = 1.0 / (Cin * K * K) ** 0.5
        weight = jax.random.uniform(k_w, (Cout, Cin, K, K), jnp.float32, -bound, bound)
        gamma = jax.random.uniform(k_g, (Cout,), jnp.float32, 0.5, 1.5)
        beta = jax.random.normal(k_b, (Cout,), dtype=jnp.float32) * 0.1
        running_mean = jax.random.normal(k_m, (Cout,), dtype=jnp.float32) * 0.1
        running_var = jax.random.uniform(k_v, (Cout,), jnp.float32, 0.5, 1.5)

        out = conv2d_module_forward(x, weight, stride=stride,
                                    bn_gamma=gamma, bn_beta=beta,
                                    bn_mean=running_mean, bn_var=running_var,
                                    bn_eps=eps, batchnorm=True, relu=True)
        out = jax.block_until_ready(out)

        y_ref = _reference(x, weight, stride, gamma, beta,
                           running_mean, running_var, eps)
        assert out.shape == y_ref.shape, (out.shape, y_ref.shape)
        max_err = float(jnp.max(jnp.abs(out - y_ref)))
        assert jnp.allclose(out, y_ref, rtol=5e-3, atol=5e-3), (stride, max_err)

    print("KERNEL_OK")
</pallas_src>

<mosaic_0001>
module attributes {stable_mosaic.version = 11 : i64} {
  func.func @_matmul_bias_act_kernel(%arg0: i32, %arg1: i32, %arg2: i32, %arg3: memref<256x128xf32, #tpu.memory_space<vmem>>, %arg4: memref<128x128xf32, #tpu.memory_space<vmem>>, %arg5: memref<1x128xf32, #tpu.memory_space<vmem>>, %arg6: memref<256x128xf32, #tpu.memory_space<vmem>>, %arg7: memref<256x128xf32, #tpu.memory_space<vmem>>) attributes {dimension_semantics = [#tpu.dimension_semantics<parallel>, #tpu.dimension_semantics<parallel>, #tpu.dimension_semantics<arbitrary>], iteration_bounds = array<i64: 1, 2, 1>, scalar_prefetch = 0 : i64, scratch_operands = 1 : i64, tpu.core_type = #tpu.core_type<tc>, window_params = [{transform_indices = @transform_0, window_bounds = array<i64: 256, 128>}, {transform_indices = @transform_1, window_bounds = array<i64: 128, 128>}, {transform_indices = @transform_2, window_bounds = array<i64: 1, 128>}, {transform_indices = @transform_3, window_bounds = array<i64: 256, 128>}]} {
    %c0_i32 = arith.constant 0 : i32
    %0 = arith.cmpi eq, %arg2, %c0_i32 : i32
    %1 = arith.extui %0 : i1 to i32
    %c0_i32_0 = arith.constant 0 : i32
    %2 = arith.cmpi ne, %1, %c0_i32_0 : i32
    scf.if %2 {
      %cst_10 = arith.constant 0.000000e+00 : f32
      %12 = vector.broadcast %cst_10 : f32 to vector<256x128xf32>
      %c0_11 = arith.constant 0 : index
      %c0_12 = arith.constant 0 : index
      %13 = vector.load %arg7[%c0_11, %c0_12] : memref<256x128xf32, #tpu.memory_space<vmem>>, vector<256x128xf32>
      tpu.vector_store %arg7[%c0_11, %c0_12], %12 {strides = array<i32>} : memref<256x128xf32, #tpu.memory_space<vmem>>, vector<256x128xf32>,
    } else {
    }
    %c0 = arith.constant 0 : index
    %c0_1 = arith.constant 0 : index
    %3 = vector.load %arg7[%c0, %c0_1] : memref<256x128xf32, #tpu.memory_space<vmem>>, vector<256x128xf32>
    %c0_2 = arith.constant 0 : index
    %c0_3 = arith.constant 0 : index
    %4 = vector.load %arg3[%c0_2, %c0_3] : memref<256x128xf32, #tpu.memory_space<vmem>>, vector<256x128xf32>
    %c0_4 = arith.constant 0 : index
    %c0_5 = arith.constant 0 : index
    %5 = vector.load %arg4[%c0_4, %c0_5] : memref<128x128xf32, #tpu.memory_space<vmem>>, vector<128x128xf32>
    %cst = arith.constant dense<0.000000e+00> : vector<256x128xf32>
    %6 = tpu.matmul %4, %5, %cst {dimension_numbers = #tpu.dot_dimension_numbers<[1], [0], [0], [1], [0, 0, 1, 1], [], []>} : vector<256x128xf32>, vector<128x128xf32>, vector<256x128xf32> -> vector<256x128xf32>
    %7 = arith.addf %3, %6 : vector<256x128xf32>
    %c0_6 = arith.constant 0 : index
    %c0_7 = arith.constant 0 : index
    %8 = vector.load %arg7[%c0_6, %c0_7] : memref<256x128xf32, #tpu.memory_space<vmem>>, vector<256x128xf32>
    tpu.vector_store %arg7[%c0_6, %c0_7], %7 {strides = array<i32>} : memref<256x128xf32, #tpu.memory_space<vmem>>, vector<256x128xf32>,
    %c0_i32_8 = arith.constant 0 : i32
    %9 = arith.cmpi eq, %arg2, %c0_i32_8 : i32
    %10 = arith.extui %9 : i1 to i32
    %c0_i32_9 = arith.constant 0 : i32
    %11 = arith.cmpi ne, %10, %c0_i32_9 : i32
    scf.if %11 {
      %c0_10 = arith.constant 0 : index
      %c0_11 = arith.constant 0 : index
      %12 = vector.load %arg7[%c0_10, %c0_11] : memref<256x128xf32, #tpu.memory_space<vmem>>, vector<256x128xf32>
      %c0_12 = arith.constant 0 : index
      %c0_13 = arith.constant 0 : index
      %13 = vector.load %arg5[%c0_12, %c0_13] : memref<1x128xf32, #tpu.memory_space<vmem>>, vector<1x128xf32>
      %14 = vector.broadcast %13 : vector<1x128xf32> to vector<256x128xf32>
      %15 = arith.addf %12, %14 : vector<256x128xf32>
      %cst_14 = arith.constant 0.000000e+00 : f32
      %16 = vector.broadcast %cst_14 : f32 to vector<256x128xf32>
      %17 = arith.maximumf %15, %16 : vector<256x128xf32>
      %c0_15 = arith.constant 0 : index
      %c0_16 = arith.constant 0 : index
      %18 = vector.load %arg6[%c0_15, %c0_16] : memref<256x128xf32, #tpu.memory_space<vmem>>, vector<256x128xf32>
      tpu.vector_store %arg6[%c0_15, %c0_16], %17 {strides = array<i32>} : memref<256x128xf32, #tpu.memory_space<vmem>>, vector<256x128xf32>,
    } else {
    }
    return
  }
  func.func @transform_0(%arg0: i32, %arg1: i32, %arg2: i32) -> (i32, i32) {
    %c0_i32 = arith.constant 0 : i32
    return %arg1, %arg2 : i32, i32
  }
  func.func @transform_1(%arg0: i32, %arg1: i32, %arg2: i32) -> (i32, i32) {
    %c0_i32 = arith.constant 0 : i32
    return %arg2, %arg0 : i32, i32
  }
  func.func @transform_2(%arg0: i32, %arg1: i32, %arg2: i32) -> (i32, i32) {
    %c0_i32 = arith.constant 0 : i32
    %c0_i32_0 = arith.constant 0 : i32
    return %c0_i32, %arg0 : i32, i32
  }
  func.func @transform_3(%arg0: i32, %arg1: i32, %arg2: i32) -> (i32, i32) {
    %c0_i32 = arith.constant 0 : i32
    return %arg1, %arg0 : i32, i32
  }
}

</mosaic_0001>

<bundles_post_ra>
// kernel: tpu_custom_call.1
= control target key start
LH: loop header
LB: loop body
LE: loop exit
PB: predicated region body
PF: predicated region fallthrough
CT: control target
= control target key end

     0   :  { %8 = vsyncpa [#allocation4], 0  ;;  %s1710_s0 = inlined_call_operand.hbm [shape: f32[512,128], index: 0, kind: input, shape index: {}]   ;;  %s1711_s1 = inlined_call_operand.hbm [shape: f32[128,128], index: 1, kind: input, shape index: {}]   ;;  %s1712_s2 = inlined_call_operand.vmem [shape: f32[1,128], index: 2, kind: input, shape index: {}]   ;;  %s1713_s3 = inlined_call_operand.hbm [shape: f32[512,128], index: 3, kind: output, shape index: {}]  }
   0x1   :  { %10 = vsyncpa [#allocation4 + $0x1], 0 }
   0x2   :  { %11 = vsyncpa [#allocation7], 0 }
   0x3   :  { %12 = vsyncpa [#allocation5], 0 }
   0x4   :  { %14 = vsyncpa [#allocation5 + $0x1], 0  ;;  %s1375_s12 = smov 0   ;;  %s1377_s13 = smov 0  }
   0x5   :  { %s1379_s14 = smov 0   ;;  %s1381_s15 = smov 0  }
   0x6   :  { %s1383_s16 = smov 0   ;;  %s1385_s17 = smov 0  }
   0x7 LB: > { %s928_s18 = sadd.s32 4294967295, %s1346_s17   ;;  %s929_s19 = sadd.s32 4294967294, %s1346_s17   ;;  %s1346_s17 = sphi %s1385_s17, %s20_s17   ;;  %s1342_s16 = sphi %s1383_s16, %s1737_s16   ;;  %s1338_s15 = sphi %s1381_s15, %s1736_s15   ;;  %s1334_s14 = sphi %s1379_s14, %s1735_s14   ;;  %s1330_s13 = sphi %s1377_s13, %s1734_s13   ;;  %s1326_s12 = sphi %s1375_s12, %s1733_s12  }
   0x8   : > { %p61_p0 = scmp.ne.s32.totalorder %s1330_s13, %s1326_s12  ;;  %p1409_p1 = scmp.eq.s32.totalorder %s928_s18, 0 }
   0x9   : > { %p1413_p2 = scmp.eq.s32.totalorder %s928_s18, 1  ;;  %p147_p3 = scmp.eq.s32.totalorder %s929_s19, 1 }
   0xa   : > { %s1718_s20 = scalar_select %p1409_p1, 1, 0 }
   0xb   : > { %s1719_s21 = scalar_select %p1413_p2, 1, 0 }
   0xc   : > { %p1419_p4 = por %p1409_p1, %p61_p0  ;;  %p930_p5 = scmp.ge.s32.totalorder %s1346_s17, 1 }
   0xd   : > { %p1424_p6 = por %p147_p3, %p61_p0  ;;  %p154_p7 = scmp.lt.s32.totalorder %s1346_s17, 3 }
   0xe   : > { %s1720_s22 = scalar_select %p1419_p4, 1, 0 }
   0xf   : > { %s1721_s23 = scalar_select %p1424_p6, 1, 0 }
  0x10   : > { %p1429_p8 = pnand %p930_p5, %p154_p7  ;;  %s1348_s25 = smov [#allocation6]  }
  0x11   : > { %s170_s26 = sshll.u32 %s1348_s25, 4  ;;  %s35_s28 = sadd.s32 1, %s1342_s16  ;;  %s171_s26 = int_to_ptr.vmem [resolvable:$true] %s170_s26 }
  0x12   : > { %s1722_s24 = scalar_select %p1429_p8, 1, 0 }
  0x13   : > { %p1133_p9 = pneg %p1429_p8  ;;  %s1202_s4 = scalar_lea.hbm %s1711_s1, 2048 }
  0x14   : > { %p1203_p12 = scmp.ne.s32.totalorder %s1711_s1, %s1202_s4  ;;  %p1209_p5 = scmp.lt.u32.totalorder %s1202_s4, %s1711_s1 }
  0x15   : > { %p1438_p11 = pnand %p1133_p9, %p1409_p1 }
  0x17   : > { %p1204_p13 = pneg %p1438_p11 }
  0x19   : > { %p1205_p0 = pnand %p1204_p13, %p1203_p12 }
  0x1b   : > { %p1206_p3 = pneg %p1205_p0 }
  0x1d   : > { %p1211_p7 = pnand %p1209_p5, %p1206_p3 }
  0x1f   : > { %1214 = shalt.err (!%p1211_p7)
}
  0x20   : > { %s1215_s9 = scalar_lea.vmem %s171_s26, 2048  ;;  %p1223_p1 = scmp.lt.s32.totalorder %s171_s26, %s171_s26 }
  0x21   : > { %p1216_p9 = scmp.ne.s32.totalorder %s171_s26, %s1215_s9  ;;  %p1224_p4 = scmp.lt.s32.totalorder %s1215_s9, %s1215_s9 }
  0x23   : > { %p1218_p10 = pnand %p1216_p9, %p1204_p13  ;;  %p1225_p8 = por %p1224_p4, %p1223_p1 }
  0x25   : > { %p1219_p6 = pneg %p1218_p10 }
  0x27   : > { %p1226_p2 = pnand %p1225_p8, %p1219_p6 }
  0x29   : > { %1229 = shalt.err (!%p1226_p2)
}
  0x2a   : > { %s1349_s10 = smov 128   ;;  %s1350_s11 = smov 8  }
  0x2b   : > { %1136 = dma.hbm_to_vmem [thread:$0]  (!%p1438_p11), %s1711_s1, 2048, %s171_s26, [#allocation7], %s1349_s10, %s1349_s10, %s1350_s11  }
  0x2c   : > { %p37_p1 = scmp.ge.s32.totalorder %s35_s28, 2  ;;  %s48_s25 = sadd.s32 1, %s1334_s14 }
  0x2d   : > { %p55_p2 = scmp.ne.s32.totalorder %s1334_s14, %s1330_s13  ;;  %p56_p4 = scmp.eq.s32.totalorder %s1346_s17, 0 }
  0x2e   : > { %s1739_s28 = smov (%p37_p1, %s35_s28), 0  ;;  %p1725_p8 = scmp.ne.s32.totalorder %s1719_s21, 0 }
  0x2f   : > { %p1468_p6 = por %p56_p4, %p55_p2  ;;  %s43_s30 = ssub.s32 %s1342_s16, %s1739_s28 }
  0x30   : > { %p1474_p10 = por %p1725_p8, %p55_p2  ;;  %p1146_p12 = scmp.lt.s32.totalorder %s1346_s17, 2 }
  0x31   : > { %p46_p11 = scmp.eq.s32.totalorder %s43_s30, 0  ;;  %s190_s26 = sand.u32 1, %s1334_s14  }
  0x32   : > { %s934_s4 = sshll.u32 %s190_s26, 8  ;;  %s947_s6 = sshll.u32 %s1342_s16, 12 }
  0x33   : > { %s1483_s5 = scalar_select %p46_p11, %s1334_s14, %s48_s25  }
  0x34   : > { %s1489_s9 = scalar_lea.hbm %s1710_s0, %s947_s6  ;;  %s194_s21 = scalar_lea.vmem [#allocation3], %s934_s4 }
  0x35   : > { %s202_s18 = sshll.u32 %s194_s21, 4  ;;  %p1495_p13 = pnand %p1146_p12, %p1468_p6  ;;  %s1491_s18 = int_to_ptr.vmem [resolvable:$true] %s202_s18 }
  0x36   : > { %s1499_s25 = scalar_lea.sflag [#allocation4], %s190_s26  ;;  %s1230_s30 = scalar_lea.hbm %s1489_s9, 4096 }
  0x37   : > { %p1231_p0 = scmp.ne.s32.totalorder %s1489_s9, %s1230_s30  ;;  %p1232_p3 = pneg %p1495_p13 }
  0x38   : > { %s1235_s29 = scalar_lea.hbm %s1710_s0, 8192  ;;  %p1236_p9 = scmp.lt.u32.totalorder %s1489_s9, %s1710_s0 }
  0x39   : > { %p1233_p5 = pnand %p1232_p3, %p1231_p0  ;;  %p1237_p1 = scmp.lt.u32.totalorder %s1235_s29, %s1230_s30 }
  0x3a   : > { %p1239_p4 = scmp.lt.u32.totalorder %s1230_s30, %s1489_s9 }
  0x3b   : > { %p1234_p7 = pneg %p1233_p5  ;;  %p1238_p2 = por %p1237_p1, %p1236_p9 }
  0x3d   : > { %p1240_p6 = por %p1239_p4, %p1238_p2 }
  0x3f   : > { %p1241_p8 = pnand %p1240_p6, %p1234_p7 }
  0x41   : > { %1244 = shalt.err (!%p1241_p8)
}
  0x42   : > { %s1245_s26 = scalar_lea.vmem %s1491_s18, 4096  ;;  %s1351_s21 = smov [#allocation3]  }
  0x43   : > { %p1246_p12 = scmp.ne.s32.totalorder %s1491_s18, %s1245_s26  ;;  %s1250_s4 = sshll.u32 %s1351_s21, 4  ;;  %s1251_s4 = int_to_ptr.vmem [resolvable:$false] %s1250_s4 }
  0x44   : > { %s1252_s6 = scalar_lea.vmem %s1251_s4, 8192  ;;  %p1253_p5 = scmp.lt.s32.totalorder %s1491_s18, %s1251_s4 }
  0x45   : > { %p1248_p11 = pnand %p1246_p12, %p1232_p3  ;;  %p1254_p9 = scmp.lt.s32.totalorder %s1252_s6, %s1245_s26 }
  0x47   : > { %p1249_p0 = pneg %p1248_p11  ;;  %p1255_p1 = por %p1254_p9, %p1253_p5 }
  0x49   : > { %p1256_p2 = pnand %p1255_p1, %p1249_p0 }
  0x4b   : > { %1259 = shalt.err (!%p1256_p2)
}
  0x4c   : > { %1140 = dma.hbm_to_vmem [thread:$0]  (!%p1495_p13), %s1489_s9, 4096, %s1491_s18, %s1499_s25, %s1349_s10, %s1349_s10, %s1350_s11  }
  0x4d   : > { %p1728_p3 = scmp.ne.s32.totalorder %s1722_s24, 0 }
  0x4e   : > { %s1533_s30 = sand.u32 (!%p1728_p3), 1, %s1330_s13   ;;  %p1729_p7 = scmp.ne.s32.totalorder (!%p1728_p3), %s1720_s22, 0 }
  0x4f   : > { %214 = sbr.rel (%p1728_p3) target bundleno = 385 (0x181), region = 32  ;;  %s938_s29 = sshll.u32 (!%p1728_p3), %s1533_s30, 8 }
  0x50   : > { %s217_s7 = scalar_lea.sflag (!%p1728_p3), [#allocation4], %s1533_s30  ;;  %s1539_s19 = scalar_lea.vmem (!%p1728_p3), [#allocation3], %s938_s29 }
  0x56   : > { %1313 = dma.done.wait (%p1729_p7), %s217_s7, 4096  }
  0x57   : > { %1315 = vsyncadd (%p1729_p7), %s217_s7, 4294963200  ;;  %p1730_p13 = scmp.ne.s32.totalorder %s1718_s20, 0 }
  0x59   : > { %1317 = dma.done.wait (%p1730_p13), [#allocation7], 2048  }
  0x5a   : > { %1319 = vsyncadd (%p1730_p13), [#allocation7], 4294965248  ;;  %v356_v0 = vld [vmem:[#allocation6] sm:$0xff]  ;;  %v357_v1 = vld [vmem:[#allocation6 + $0x8] sm:$0xff]  ;;  %s1592_s24 = scalar_lea.vmem [#allocation8], %s938_s29  ;;  %s948_s10 = sshll.u32 %s1338_s15, 12 }
  0x5b   : > { %v358_v2 = vld [vmem:[#allocation6 + $0x10] sm:$0xff]  ;;  %v1077_v3 = vpack.c.bf16 %v357_v1, %v356_v0  ;;  %v359_v4 = vld [vmem:[#allocation6 + $0x18] sm:$0xff]  ;;  %v360_v6 = vld [vmem:[#allocation6 + $0x20] sm:$0xff]  ;;  %s814_s11 = sshll.u32 %s1592_s24, 4  ;;  %s1655_s18 = scalar_lea.hbm %s1713_s3, %s948_s10  ;;  %s1657_s11 = int_to_ptr.vmem [resolvable:$true] %s814_s11 }
  0x5c   : > { %v1081_v5 = vpack.c.bf16 %v359_v4, %v358_v2  ;;  %v361_v7 = vld [vmem:[#allocation6 + $0x28] sm:$0xff]  ;;  %v324_v9 = vld [vmem:[%s1539_s19] sm:$0xff]  ;;  %v362_v11 = vld [vmem:[#allocation6 + $0x30] sm:$0xff]  ;;  %s800_s25 = scalar_lea.sflag [#allocation5], %s1533_s30  ;;  %s1260_s8 = scalar_lea.vmem %s1657_s11, 4096 }
  0x5d   : > { %1078 = vmatprep.subr.bf16.mxu0 %v1077_v3  ;;  %1109 = vmatprep.subr.bf16.mxu1 %v1077_v3  ;;  %v1085_v8 = vpack.c.bf16 %v361_v7, %v360_v6  ;;  %v340_v10 = vld [vmem:[%s1539_s19 + $0x80] sm:$0xff]  ;;  %v363_v12 = vld [vmem:[#allocation6 + $0x38] sm:$0xff]  ;;  %v365_v15 = vld [vmem:[#allocation6 + $0x48] sm:$0xff]  ;;  %p1261_p4 = scmp.ne.s32.totalorder %s1657_s11, %s1260_s8  ;;  %s1352_s26 = smov [#allocation8]  }
  0x5e   : > { %1080 = vmatpush3.bf16.msra.mxu0 %v1077_v3  ;;  %1117 = vmatpush3.bf16.msra.mxu1 %v1077_v3  ;;  %v1089_v13 = vpack.c.bf16 %v363_v12, %v362_v11  ;;  %v364_v14 = vld [vmem:[#allocation6 + $0x40] sm:$0xff]  ;;  %v366_v17 = vld [vmem:[#allocation6 + $0x50] sm:$0xff]  ;;  %v367_v18 = vld [vmem:[#allocation6 + $0x58] sm:$0xff]  ;;  %s1264_s21 = sshll.u32 %s1352_s26, 4  ;;  %s1265_s21 = int_to_ptr.vmem [resolvable:$false] %s1264_s21 }
  0x5f   : > { %1082 = vmatprep.subr.bf16.mxu0 %v1081_v5  ;;  %1110 = vmatprep.subr.bf16.mxu1 %v1081_v5  ;;  %v1093_v16 = vpack.c.bf16 %v365_v15, %v364_v14  ;;  %v1097_v19 = vpack.c.bf16 %v367_v18, %v366_v17  ;;  %v368_v20 = vld [vmem:[#allocation6 + $0x60] sm:$0xff]  ;;  %v369_v21 = vld [vmem:[#allocation6 + $0x68] sm:$0xff]  ;;  %v370_v23 = vld [vmem:[#allocation6 + $0x70] sm:$0xff]  ;;  %p1262_p6 = pnand %p1261_p4, %p1474_p10  ;;  %s1266_s4 = scalar_lea.vmem %s1265_s21, 8192 }
  0x60   : > { %1029 = vmatprep.mubr.f32.mxu0 %v324_v9  ;;  %1053 = vmatprep.mubr.f32.mxu1 %v340_v10  ;;  %v1101_v22 = vpack.c.bf16 %v369_v21, %v368_v20  ;;  %v371_v24 = vld [vmem:[#allocation6 + $0x78] sm:$0xff]  ;;  %v325_v26 = vld [vmem:[%s1539_s19 + $0x8] sm:$0xff]  ;;  %v326_v28 = vld [vmem:[%s1539_s19 + $0x10] sm:$0xff]  ;;  %p1267_p12 = scmp.lt.s32.totalorder %s1657_s11, %s1265_s21  ;;  %p1268_p11 = scmp.lt.s32.totalorder %s1266_s4, %s1260_s8 }
  0x61   : > { %v1105_v25 = vpack.c.bf16 %v371_v24, %v370_v23  ;;  %v341_v27 = vld [vmem:[%s1539_s19 + $0x88] sm:$0xff]  ;;  %v342_v29 = vld [vmem:[%s1539_s19 + $0x90] sm:$0xff]  ;;  %v327_v30 = vld [vmem:[%s1539_s19 + $0x18] sm:$0xff]  ;;  %p1263_p8 = pneg %p1262_p6 }
  0x62   : > { %1084 = vmatpush3.bf16.msra.mxu0 %v1081_v5  ;;  %1118 = vmatpush3.bf16.msra.mxu1 %v1081_v5  ;;  %v343_v31 = vld [vmem:[%s1539_s19 + $0x98] sm:$0xff]  ;;  %v328_v32 = vld [vmem:[%s1539_s19 + $0x20] sm:$0xff]  ;;  %v329_v34 = vld [vmem:[%s1539_s19 + $0x28] sm:$0xff]  ;;  %p1269_p0 = por %p1268_p11, %p1267_p12 }
  0x63   : > { %1086 = vmatprep.subr.bf16.mxu0 %v1085_v8  ;;  %1111 = vmatprep.subr.bf16.mxu1 %v1085_v8  ;;  %v344_v33 = vld [vmem:[%s1539_s19 + $0xa0] sm:$0xff]  ;;  %v345_v35 = vld [vmem:[%s1539_s19 + $0xa8] sm:$0xff]  ;;  %v330_v36 = vld [vmem:[%s1539_s19 + $0x30] sm:$0xff] }
  0x64   : > { %v346_v37 = vld [vmem:[%s1539_s19 + $0xb0] sm:$0xff]  ;;  %v331_v38 = vld [vmem:[%s1539_s19 + $0x38] sm:$0xff]  ;;  %v332_v40 = vld [vmem:[%s1539_s19 + $0x40] sm:$0xff]  ;;  %p1270_p5 = pnand %p1269_p0, %p1263_p8 }
  0x65   : > { %v347_v39 = vld [vmem:[%s1539_s19 + $0xb8] sm:$0xff]  ;;  %v348_v41 = vld [vmem:[%s1539_s19 + $0xc0] sm:$0xff]  ;;  %v333_v42 = vld [vmem:[%s1539_s19 + $0x48] sm:$0xff] }
  0x66   : > { %1088 = vmatpush3.bf16.msra.mxu0 %v1085_v8  ;;  %1119 = vmatpush3.bf16.msra.mxu1 %v1085_v8  ;;  %v349_v43 = vld [vmem:[%s1539_s19 + $0xc8] sm:$0xff]  ;;  %v334_v44 = vld [vmem:[%s1539_s19 + $0x50] sm:$0xff]  ;;  %v335_v46 = vld [vmem:[%s1539_s19 + $0x58] sm:$0xff] }
  0x67   : > { %1090 = vmatprep.subr.bf16.mxu0 %v1089_v13  ;;  %1112 = vmatprep.subr.bf16.mxu1 %v1089_v13  ;;  %v350_v45 = vld [vmem:[%s1539_s19 + $0xd0] sm:$0xff]  ;;  %v351_v47 = vld [vmem:[%s1539_s19 + $0xd8] sm:$0xff]  ;;  %v336_v48 = vld [vmem:[%s1539_s19 + $0x60] sm:$0xff] }
  0x68   : > { %v352_v49 = vld [vmem:[%s1539_s19 + $0xe0] sm:$0xff]  ;;  %v337_v50 = vld [vmem:[%s1539_s19 + $0x68] sm:$0xff]  ;;  %v338_v52 = vld [vmem:[%s1539_s19 + $0x70] sm:$0xff] }
  0x69   : > { %v353_v51 = vld [vmem:[%s1539_s19 + $0xe8] sm:$0xff]  ;;  %v354_v53 = vld [vmem:[%s1539_s19 + $0xf0] sm:$0xff]  ;;  %v339_v54 = vld [vmem:[%s1539_s19 + $0x78] sm:$0xff] }
  0x6a   : > { %1092 = vmatpush3.bf16.msra.mxu0 %v1089_v13  ;;  %1120 = vmatpush3.bf16.msra.mxu1 %v1089_v13  ;;  %v355_v55 = vld [vmem:[%s1539_s19 + $0xf8] sm:$0xff]  ;;  %v1584_v56 = vld [vmem:[%s1712_s2] ss:$0 sm:$0xff] }
  0x6b   : > { %1094 = vmatprep.subr.bf16.mxu0 %v1093_v16  ;;  %1113 = vmatprep.subr.bf16.mxu1 %v1093_v16 }
  0x6e   : > { %1096 = vmatpush3.bf16.msra.mxu0 %v1093_v16  ;;  %1121 = vmatpush3.bf16.msra.mxu1 %v1093_v16 }
  0x6f   : > { %1098 = vmatprep.subr.bf16.mxu0 %v1097_v19  ;;  %1114 = vmatprep.subr.bf16.mxu1 %v1097_v19 }
  0x72   : > { %1100 = vmatpush3.bf16.msra.mxu0 %v1097_v19  ;;  %1122 = vmatpush3.bf16.msra.mxu1 %v1097_v19 }
  0x73   : > { %1102 = vmatprep.subr.bf16.mxu0 %v1101_v22  ;;  %1115 = vmatprep.subr.bf16.mxu1 %v1101_v22 }
  0x76   : > { %1104 = vmatpush3.bf16.msra.mxu0 %v1101_v22  ;;  %1123 = vmatpush3.bf16.msra.mxu1 %v1101_v22 }
  0x77   : > { %1106 = vmatprep.subr.bf16.mxu0 %v1105_v25  ;;  %1116 = vmatprep.subr.bf16.mxu1 %v1105_v25 }
  0x7a   : > { %1108 = vmatpush3.bf16.msra.mxu0 %v1105_v25  ;;  %1124 = vmatpush3.bf16.msra.mxu1 %v1105_v25 }
  0x7d   : > { %1030 = vmatmul.mubr.f32.vlgmr.msra.gmra.mrb[0].mxu0 %v325_v26  ;;  %1054 = vmatmul.mubr.f32.vlgmr.msra.gmra.mrb[0].mxu1 %v341_v27 }
  0x7e   : > { %1032 = vmatprep.mubr.f32.mxu0 %v326_v28  ;;  %1056 = vmatprep.mubr.f32.mxu1 %v342_v29 }
  0x81   : > { %1033 = vmatmul.mubr.f32.gmra.mrb[2].mxu0 %v327_v30  ;;  %1057 = vmatmul.mubr.f32.gmra.mrb[2].mxu1 %v343_v31 }
  0x82   : > { %1035 = vmatprep.mubr.f32.mxu0 %v328_v32  ;;  %1059 = vmatprep.mubr.f32.mxu1 %v344_v33 }
  0x85   : > { %1036 = vmatmul.mubr.f32.gmra.mrb[4].mxu0 %v329_v34  ;;  %1060 = vmatmul.mubr.f32.gmra.mrb[4].mxu1 %v345_v35 }
  0x86   : > { %1038 = vmatprep.mubr.f32.mxu0 %v330_v36  ;;  %1062 = vmatprep.mubr.f32.mxu1 %v346_v37 }
  0x89   : > { %1039 = vmatmul.mubr.f32.gmra.mrb[6].mxu0 %v331_v38  ;;  %1063 = vmatmul.mubr.f32.gmra.mrb[6].mxu1 %v347_v39 }
  0x8a   : > { %1041 = vmatprep.mubr.f32.mxu0 %v332_v40  ;;  %1065 = vmatprep.mubr.f32.mxu1 %v348_v41 }
  0x8d   : > { %1042 = vmatmul.mubr.f32.gmra.mrb[8].mxu0 %v333_v42  ;;  %1066 = vmatmul.mubr.f32.gmra.mrb[8].mxu1 %v349_v43 }
  0x8e   : > { %1044 = vmatprep.mubr.f32.mxu0 %v334_v44  ;;  %1068 = vmatprep.mubr.f32.mxu1 %v350_v45 }
  0x91   : > { %1045 = vmatmul.mubr.f32.gmra.mrb[10].mxu0 %v335_v46  ;;  %1069 = vmatmul.mubr.f32.gmra.mrb[10].mxu1 %v351_v47 }
  0x92   : > { %1047 = vmatprep.mubr.f32.mxu0 %v336_v48  ;;  %1071 = vmatprep.mubr.f32.mxu1 %v352_v49 }
  0x95   : > { %1048 = vmatmul.mubr.f32.gmra.mrb[12].mxu0 %v337_v50  ;;  %1072 = vmatmul.mubr.f32.gmra.mrb[12].mxu1 %v353_v51 }
  0x96   : > { %1050 = vmatprep.mubr.f32.mxu0 %v338_v52  ;;  %1074 = vmatprep.mubr.f32.mxu1 %v354_v53 }
  0x99   : > { %1051 = vmatmul.mubr.f32.gmra.mrb[14].mxu0 %v339_v54  ;;  %1075 = vmatmul.mubr.f32.gmra.mrb[14].mxu1 %v355_v55 }
 0x150   : > { %v1031_v57 = vpop.f32.mrb[0].mxu0  ;;  %v1055_v58 = vpop.f32.mrb[0].mxu1 }
 0x151   : > { %v704_v59 = vadd.f32 %v1031_v57, %v1584_v56  ;;  %v720_v60 = vadd.f32 %v1055_v58, %v1584_v56  ;;  %v438_v61 = vpop.f32.mrb[1].mxu0  ;;  %v518_v62 = vpop.f32.mrb[1].mxu1 }
 0x152   : > { %v703_v63 = vadd.f32 %v1584_v56, %v438_v61  ;;  %v719_v0 = vadd.f32 %v1584_v56, %v518_v62 }
 0x153   : > { %v736_v1 = vmax.f32 %v704_v59, 0.0  ;;  %v752_v2 = vmax.f32 %v720_v60, 0.0 }
 0x154   : > { %v735_v3 = vmax.f32 %v703_v63, 0.0  ;;  %v751_v4 = vmax.f32 %v719_v0, 0.0  ;;  %v1034_v5 = vpop.f32.mrb[2].mxu0  ;;  %v1058_v6 = vpop.f32.mrb[2].mxu1 }
 0x155   : > { %768 = vst [vmem:[%s1592_s24 + $0x8] sm:$0xff] %v736_v1  ;;  %784 = vst [vmem:[%s1592_s24 + $0x88] sm:$0xff] %v752_v2  ;;  %v706_v7 = vadd.f32 %v1034_v5, %v1584_v56  ;;  %v722_v8 = vadd.f32 %v1058_v6, %v1584_v56  ;;  %v448_v9 = vpop.f32.mrb[3].mxu0  ;;  %v528_v10 = vpop.f32.mrb[3].mxu1 }
 0x156   : > { %767 = vst [vmem:[%s1592_s24] sm:$0xff] %v735_v3  ;;  %783 = vst [vmem:[%s1592_s24 + $0x80] sm:$0xff] %v751_v4  ;;  %v705_v11 = vadd.f32 %v1584_v56, %v448_v9  ;;  %v721_v12 = vadd.f32 %v1584_v56, %v528_v10 }
 0x157   : > { %v738_v13 = vmax.f32 %v706_v7, 0.0  ;;  %v754_v14 = vmax.f32 %v722_v8, 0.0 }
 0x158   : > { %v737_v15 = vmax.f32 %v705_v11, 0.0  ;;  %v753_v16 = vmax.f32 %v721_v12, 0.0  ;;  %v1037_v17 = vpop.f32.mrb[4].mxu0  ;;  %v1061_v18 = vpop.f32.mrb[4].mxu1 }
 0x159   : > { %770 = vst [vmem:[%s1592_s24 + $0x18] sm:$0xff] %v738_v13  ;;  %786 = vst [vmem:[%s1592_s24 + $0x98] sm:$0xff] %v754_v14  ;;  %v708_v19 = vadd.f32 %v1037_v17, %v1584_v56  ;;  %v724_v20 = vadd.f32 %v1061_v18, %v1584_v56  ;;  %v458_v21 = vpop.f32.mrb[5].mxu0  ;;  %v538_v22 = vpop.f32.mrb[5].mxu1 }
 0x15a   : > { %769 = vst [vmem:[%s1592_s24 + $0x10] sm:$0xff] %v737_v15  ;;  %785 = vst [vmem:[%s1592_s24 + $0x90] sm:$0xff] %v753_v16  ;;  %v707_v23 = vadd.f32 %v1584_v56, %v458_v21  ;;  %v723_v24 = vadd.f32 %v1584_v56, %v538_v22 }
 0x15b   : > { %v740_v25 = vmax.f32 %v708_v19, 0.0  ;;  %v756_v26 = vmax.f32 %v724_v20, 0.0 }
 0x15c   : > { %v739_v27 = vmax.f32 %v707_v23, 0.0  ;;  %v755_v28 = vmax.f32 %v723_v24, 0.0  ;;  %v1040_v29 = vpop.f32.mrb[6].mxu0  ;;  %v1064_v30 = vpop.f32.mrb[6].mxu1 }
 0x15d   : > { %772 = vst [vmem:[%s1592_s24 + $0x28] sm:$0xff] %v740_v25  ;;  %788 = vst [vmem:[%s1592_s24 + $0xa8] sm:$0xff] %v756_v26  ;;  %v710_v31 = vadd.f32 %v1040_v29, %v1584_v56  ;;  %v726_v32 = vadd.f32 %v1064_v30, %v1584_v56  ;;  %v468_v33 = vpop.f32.mrb[7].mxu0  ;;  %v548_v34 = vpop.f32.mrb[7].mxu1 }
 0x15e   : > { %771 = vst [vmem:[%s1592_s24 + $0x20] sm:$0xff] %v739_v27  ;;  %787 = vst [vmem:[%s1592_s24 + $0xa0] sm:$0xff] %v755_v28  ;;  %v709_v35 = vadd.f32 %v1584_v56, %v468_v33  ;;  %v725_v36 = vadd.f32 %v1584_v56, %v548_v34 }
 0x15f   : > { %v742_v37 = vmax.f32 %v710_v31, 0.0  ;;  %v758_v38 = vmax.f32 %v726_v32, 0.0 }
 0x160   : > { %v741_v39 = vmax.f32 %v709_v35, 0.0  ;;  %v757_v40 = vmax.f32 %v725_v36, 0.0  ;;  %v1043_v41 = vpop.f32.mrb[8].mxu0  ;;  %v1067_v42 = vpop.f32.mrb[8].mxu1 }
 0x161   : > { %774 = vst [vmem:[%s1592_s24 + $0x38] sm:$0xff] %v742_v37  ;;  %790 = vst [vmem:[%s1592_s24 + $0xb8] sm:$0xff] %v758_v38  ;;  %v712_v43 = vadd.f32 %v1043_v41, %v1584_v56  ;;  %v728_v44 = vadd.f32 %v1067_v42, %v1584_v56  ;;  %v478_v45 = vpop.f32.mrb[9].mxu0  ;;  %v558_v46 = vpop.f32.mrb[9].mxu1 }
 0x162   : > { %773 = vst [vmem:[%s1592_s24 + $0x30] sm:$0xff] %v741_v39  ;;  %789 = vst [vmem:[%s1592_s24 + $0xb0] sm:$0xff] %v757_v40  ;;  %v711_v47 = vadd.f32 %v1584_v56, %v478_v45  ;;  %v727_v48 = vadd.f32 %v1584_v56, %v558_v46 }
 0x163   : > { %v744_v49 = vmax.f32 %v712_v43, 0.0  ;;  %v760_v50 = vmax.f32 %v728_v44, 0.0 }
 0x164   : > { %v743_v51 = vmax.f32 %v711_v47, 0.0  ;;  %v759_v52 = vmax.f32 %v727_v48, 0.0  ;;  %v1046_v53 = vpop.f32.mrb[10].mxu0  ;;  %v1070_v54 = vpop.f32.mrb[10].mxu1 }
 0x165   : > { %776 = vst [vmem:[%s1592_s24 + $0x48] sm:$0xff] %v744_v49  ;;  %792 = vst [vmem:[%s1592_s24 + $0xc8] sm:$0xff] %v760_v50  ;;  %v714_v55 = vadd.f32 %v1046_v53, %v1584_v56  ;;  %v730_v57 = vadd.f32 %v1070_v54, %v1584_v56  ;;  %v488_v58 = vpop.f32.mrb[11].mxu0  ;;  %v568_v59 = vpop.f32.mrb[11].mxu1 }
 0x166   : > { %775 = vst [vmem:[%s1592_s24 + $0x40] sm:$0xff] %v743_v51  ;;  %791 = vst [vmem:[%s1592_s24 + $0xc0] sm:$0xff] %v759_v52  ;;  %v713_v60 = vadd.f32 %v1584_v56, %v488_v58  ;;  %v729_v61 = vadd.f32 %v1584_v56, %v568_v59 }
 0x167   : > { %v746_v62 = vmax.f32 %v714_v55, 0.0  ;;  %v762_v63 = vmax.f32 %v730_v57, 0.0 }
 0x168   : > { %v745_v0 = vmax.f32 %v713_v60, 0.0  ;;  %v761_v1 = vmax.f32 %v729_v61, 0.0  ;;  %v1049_v2 = vpop.f32.mrb[12].mxu0  ;;  %v1073_v3 = vpop.f32.mrb[12].mxu1 }
 0x169   : > { %778 = vst [vmem:[%s1592_s24 + $0x58] sm:$0xff] %v746_v62  ;;  %794 = vst [vmem:[%s1592_s24 + $0xd8] sm:$0xff] %v762_v63  ;;  %v716_v4 = vadd.f32 %v1049_v2, %v1584_v56  ;;  %v732_v5 = vadd.f32 %v1073_v3, %v1584_v56  ;;  %v498_v6 = vpop.f32.mrb[13].mxu0  ;;  %v578_v7 = vpop.f32.mrb[13].mxu1 }
 0x16a   : > { %777 = vst [vmem:[%s1592_s24 + $0x50] sm:$0xff] %v745_v0  ;;  %793 = vst [vmem:[%s1592_s24 + $0xd0] sm:$0xff] %v761_v1  ;;  %v715_v8 = vadd.f32 %v1584_v56, %v498_v6  ;;  %v731_v9 = vadd.f32 %v1584_v56, %v578_v7 }
 0x16b   : > { %v748_v10 = vmax.f32 %v716_v4, 0.0  ;;  %v764_v11 = vmax.f32 %v732_v5, 0.0 }
 0x16c   : > { %v747_v12 = vmax.f32 %v715_v8, 0.0  ;;  %v763_v13 = vmax.f32 %v731_v9, 0.0  ;;  %v1052_v14 = vpop.f32.mrb[14].mxu0  ;;  %v1076_v15 = vpop.f32.mrb[14].mxu1 }
 0x16d   : > { %780 = vst [vmem:[%s1592_s24 + $0x68] sm:$0xff] %v748_v10  ;;  %796 = vst [vmem:[%s1592_s24 + $0xe8] sm:$0xff] %v764_v11  ;;  %v718_v16 = vadd.f32 %v1052_v14, %v1584_v56  ;;  %v734_v17 = vadd.f32 %v1076_v15, %v1584_v56  ;;  %v508_v18 = vpop.f32.mrb[15].mxu0  ;;  %v588_v19 = vpop.f32.mrb[15].mxu1 }
 0x16e   : > { %779 = vst [vmem:[%s1592_s24 + $0x60] sm:$0xff] %v747_v12  ;;  %795 = vst [vmem:[%s1592_s24 + $0xe0] sm:$0xff] %v763_v13  ;;  %v717_v20 = vadd.f32 %v1584_v56, %v508_v18  ;;  %v733_v21 = vadd.f32 %v1584_v56, %v588_v19 }
 0x16f   : > { %v750_v22 = vmax.f32 %v718_v16, 0.0  ;;  %v766_v23 = vmax.f32 %v734_v17, 0.0 }
 0x170   : > { %v749_v24 = vmax.f32 %v717_v20, 0.0  ;;  %v765_v25 = vmax.f32 %v733_v21, 0.0 }
 0x171   : > { %782 = vst [vmem:[%s1592_s24 + $0x78] sm:$0xff] %v750_v22  ;;  %798 = vst [vmem:[%s1592_s24 + $0xf8] sm:$0xff] %v766_v23 }
 0x172   : > { %781 = vst [vmem:[%s1592_s24 + $0x70] sm:$0xff] %v749_v24  ;;  %797 = vst [vmem:[%s1592_s24 + $0xf0] sm:$0xff] %v765_v25 }
 0x173   : > { %1273 = shalt.err (!%p1270_p5)
}
 0x174   : > { %s1274_s6 = scalar_lea.hbm %s1655_s18, 4096  ;;  %s1278_s19 = scalar_lea.hbm %s1713_s3, 8192 }
 0x175   : > { %p1275_p9 = scmp.ne.s32.totalorder %s1655_s18, %s1274_s6  ;;  %p1279_p3 = scmp.lt.u32.totalorder %s1655_s18, %s1713_s3 }
 0x176   : > { %p1280_p7 = scmp.lt.u32.totalorder %s1278_s19, %s1274_s6  ;;  %p1282_p4 = scmp.lt.u32.totalorder %s1274_s6, %s1655_s18 }
 0x177   : > { %p1276_p1 = pnand %p1275_p9, %p1474_p10 }
 0x178   : > { %p1281_p13 = por %p1280_p7, %p1279_p3 }
 0x179   : > { %p1277_p2 = pneg %p1276_p1 }
 0x17a   : > { %p1283_p6 = por %p1282_p4, %p1281_p13 }
 0x17c   : > { %p1284_p8 = pnand %p1283_p6, %p1277_p2 }
 0x17e   : > { %1287 = shalt.err (!%p1284_p8)
}
 0x17f   : > { %s1353_s24 = smov 128   ;;  %s1354_s10 = smov 8  }
 0x180   : > { %1131 = dma.vmem_to_hbm [thread:$0]  (%p1474_p10), %s1657_s11, 4096, %s1655_s18, %s800_s25, %s1353_s24, %s1353_s24, %s1354_s10  }
 0x181 PF: > { %s829_s15 = sand.u32 1, %s1326_s12   ;;  %p1731_p12 = scmp.ne.s32.totalorder %s1721_s23, 0 }
 0x182   : > { %p1732_p11 = scmp.ge.s32.totalorder %s1346_s17, 2  ;;  %s830_s9 = scalar_lea.sflag [#allocation5], %s829_s15 }
 0x184   : > { %p1142_p0 = pnand %p1732_p11, %p1731_p12 }
 0x186   : > { %1321 = dma.done.wait (!%p1142_p0), %s830_s9, 4096  }
 0x187   : > { %1323 = vsyncadd (!%p1142_p0), %s830_s9, 4294963200  ;;  %s20_s17 = sadd.s32 1, %s1346_s17   ;;  %s1733_s12 = smov %s1330_s13 }
 0x188   : > { %p17_p5 = scmp.ge.s32.totalorder %s20_s17, 4   ;;  %s1734_s13 = smov %s1334_s14 }
 0x189   : > { %s1735_s14 = smov %s1483_s5  ;;  %s1736_s15 = smov %s1342_s16 }
 0x18a   : > { %s1737_s16 = smov %s1739_s28  ;;  %19 = sbr.rel (!%p17_p5) target bundleno = 7 (0x7), region = 93 }
 0x191   :  { %835 = vsyncpa [#allocation4], 1 }
 0x192   :  { %837 = vsyncpa [#allocation4 + $0x1], 1 }
 0x193   :  { %838 = vsyncpa [#allocation7], 1 }
 0x194   :  { %839 = vsyncpa [#allocation5], 1 }
 0x195   :  { %841 = vsyncpa [#allocation5 + $0x1], 1 }

</bundles_post_ra>
